<compile_context>
chip_gen: v6e
topology: v6e:2x2x1
jax: 0.10.0
libtpu: 0.0.40
codegen_flags: <defaults>
</compile_context>

<pallas_src>
import jax
import jax.numpy as jnp
from jax.experimental import pallas as pl
from jax.experimental.pallas import tpu as pltpu


def _upsample_scatter_kernel(x_ref, w_ref, o_ref):
    # x_ref: (TM, K) in x.dtype, w_ref: (K, D_pad) one-hot in x.dtype,
    # o_ref: (TM, D_pad) float32.  Single MXU matmul per grid step.
    o_ref[...] = jnp.dot(x_ref[...], w_ref[...],
                         preferred_element_type=jnp.float32)


def _choose_row_tile(m, d_pad):
    """Largest row tile (multiple of 16) whose double-buffered f32 output
    tile stays <= ~16 MiB, capped at 1024 rows and at the (padded) M."""
    budget_bytes = 16 * 1024 * 1024          # per-buffer-pair output budget
    tm = budget_bytes // (2 * d_pad * 4)      # 2 buffers * 4 bytes/elem
    tm = min(1024, max(16, tm))
    tm = max(16, (tm // 16) * 16)             # bf16 sublane tile is 16
    m_pad16 = ((m + 15) // 16) * 16
    return min(tm, m_pad16)


def upsample_output(x, attention_output, idx):
    """Pallas equivalent of UpSampleOutput(idx).forward(x, attention_output)."""
    B, S, K = x.shape
    Bo, So, D = attention_output.shape
    assert (B, S) == (Bo, So)
    assert idx.shape == (K,)
    # Precondition: idx must be unique (PyTorch index-assign keeps last write;
    # the one-hot matmul would sum duplicates instead).
    # TODO(synk): no cheap in-kernel uniqueness check; enforced in the wrapper.

    M = B * S
    D_pad = max(128, ((D + 127) // 128) * 128)        # lane-dense output tiles
    TM = _choose_row_tile(M, D_pad)
    M_pad = ((M + TM - 1) // TM) * TM
    grid = (M_pad // TM,)

    x2d = x.reshape(M, K)
    if M_pad != M:
        x2d = jnp.pad(x2d, ((0, M_pad - M), (0, 0)))

    # One-hot scatter matrix, precomputed once, same dtype as x (bit-exact:
    # entries are 0/1; f32 accumulation happens on the MXU).
    one_hot = jax.nn.one_hot(idx.astype(jnp.int32), D_pad, dtype=x.dtype)  # (K, D_pad)

    itemsize = jnp.dtype(x.dtype).itemsize
    cost = pl.CostEstimate(
        flops=2 * M_pad * K * D_pad,
        transcendentals=0,
        bytes_accessed=M_pad * K * itemsize + K * D_pad * itemsize
                       + M_pad * D_pad * 4,
    )

    out2d = pl.pallas_call(
        _upsample_scatter_kernel,
        out_shape=jax.ShapeDtypeStruct((M_pad, D_pad), jnp.float32),
        grid_spec=pltpu.PrefetchScalarGridSpec(
            num_scalar_prefetch=0,
            grid=grid,
            in_specs=[
                pl.BlockSpec((TM, K), lambda i: (i, 0)),       # x rows
                pl.BlockSpec((K, D_pad), lambda i: (0, 0)),    # one-hot (resident)
            ],
            out_specs=pl.BlockSpec((TM, D_pad), lambda i: (i, 0)),
        ),
        compiler_params=pltpu.CompilerParams(
            dimension_semantics=("parallel",),
            vmem_limit_bytes=32 * 1024 * 1024,
        ),
        cost_estimate=cost,
    )(x2d, one_hot)

    return out2d[:M, :D].reshape(B, S, D)


def upsample_output_ref(x, attention_output, idx):
    """Pure-JAX reference mirroring the PyTorch forward."""
    out = jnp.zeros(attention_output.shape, dtype=jnp.float32)
    return out.at[:, :, idx].set(x.astype(jnp.float32))


if __name__ == "__main__":
    key = jax.random.PRNGKey(0)
    kx, ka = jax.random.split(key)

    B, S, D, K = 2, 8, 32, 16
    # deterministic, unique indices into the hidden dim (every other position)
    idx = jnp.arange(0, D, 2, dtype=jnp.int32)                 # (K,)

    x = jax.random.normal(kx, (B, S, K), dtype=jnp.bfloat16)   # low-rank output
    attention_output = jax.random.normal(ka, (B, S, D), dtype=jnp.float32)

    out = upsample_output(x, attention_output, idx)
    out = jax.block_until_ready(out)

    ref = upsample_output_ref(x, attention_output, idx)
    assert out.shape == attention_output.shape
    assert out.dtype == jnp.float32
    assert jnp.allclose(out, ref, atol=1e-6, rtol=1e-6)

    print("KERNEL_OK")
</pallas_src>

<mosaic_0001>
module attributes {stable_mosaic.version = 11 : i64} {
  func.func @_upsample_scatter_kernel(%arg0: i32, %arg1: memref<16x16xbf16, #tpu.memory_space<vmem>>, %arg2: memref<16x128xbf16, #tpu.memory_space<vmem>>, %arg3: memref<16x128xf32, #tpu.memory_space<vmem>>) attributes {dimension_semantics = [#tpu.dimension_semantics<parallel>], iteration_bounds = array<i64: 1>, scalar_prefetch = 0 : i64, scratch_operands = 0 : i64, tpu.core_type = #tpu.core_type<tc>, window_params = [{transform_indices = @transform_0, window_bounds = array<i64: 16, 16>}, {pipeline_mode = #tpu.pipeline_mode<synchronous>, transform_indices = @transform_1, window_bounds = array<i64: 16, 128>}, {transform_indices = @transform_2, window_bounds = array<i64: 16, 128>}]} {
    %c0 = arith.constant 0 : index
    %c0_0 = arith.constant 0 : index
    %0 = vector.load %arg1[%c0, %c0_0] : memref<16x16xbf16, #tpu.memory_space<vmem>>, vector<16x16xbf16>
    %c0_1 = arith.constant 0 : index
    %c0_2 = arith.constant 0 : index
    %1 = vector.load %arg2[%c0_1, %c0_2] : memref<16x128xbf16, #tpu.memory_space<vmem>>, vector<16x128xbf16>
    %cst = arith.constant dense<0.000000e+00> : vector<16x128xf32>
    %2 = tpu.matmul %0, %1, %cst {dimension_numbers = #tpu.dot_dimension_numbers<[1], [0], [0], [1], [0, 0, 1, 1], [], []>} : vector<16x16xbf16>, vector<16x128xbf16>, vector<16x128xf32> -> vector<16x128xf32>
    %c0_3 = arith.constant 0 : index
    %c0_4 = arith.constant 0 : index
    %3 = vector.load %arg3[%c0_3, %c0_4] : memref<16x128xf32, #tpu.memory_space<vmem>>, vector<16x128xf32>
    tpu.vector_store %arg3[%c0_3, %c0_4], %2 {strides = array<i32>} : memref<16x128xf32, #tpu.memory_space<vmem>>, vector<16x128xf32>,
    return
  }
  func.func @transform_0(%arg0: i32) -> (i32, i32) {
    %c0_i32 = arith.constant 0 : i32
    %c0_i32_0 = arith.constant 0 : i32
    return %arg0, %c0_i32 : i32, i32
  }
  func.func @transform_1(%arg0: i32) -> (i32, i32) {
    %c0_i32 = arith.constant 0 : i32
    %c0_i32_0 = arith.constant 0 : i32
    %c0_i32_1 = arith.constant 0 : i32
    return %c0_i32, %c0_i32_0 : i32, i32
  }
  func.func @transform_2(%arg0: i32) -> (i32, i32) {
    %c0_i32 = arith.constant 0 : i32
    %c0_i32_0 = arith.constant 0 : i32
    return %arg0, %c0_i32 : i32, i32
  }
}

</mosaic_0001>

<bundles_post_ra>
// kernel: tpu_custom_call.1
= control target key start
LH: loop header
LB: loop body
LE: loop exit
PB: predicated region body
PF: predicated region fallthrough
CT: control target
= control target key end

     0   :  { %7 = vsyncpa [#allocation3], 0  ;;  %s242_s0 = inlined_call_operand.hbm [shape: bf16[16,16], index: 0, kind: input, shape index: {}]   ;;  %s243_s1 = inlined_call_operand.hbm [shape: bf16[16,128], index: 1, kind: input, shape index: {}]   ;;  %s244_s2 = inlined_call_operand.hbm [shape: f32[16,128], index: 2, kind: output, shape index: {}]  }
   0x1   :  { %8 = vsyncpa [#allocation6], 0 }
   0x2   :  { %9 = vsyncpa [#allocation4], 0  ;;  %s209_s9 = smov [#allocation2]  }
   0x3   :  { %s15_s10 = sshll.u32 %s209_s9, 4  ;;  %s16_s10 = int_to_ptr.vmem [resolvable:$true] %s15_s10 }
   0x4   :  { %s151_s11 = scalar_lea.vmem %s16_s10, 128  ;;  %p156_p1 = scmp.lt.s32.totalorder %s16_s10, %s16_s10 }
   0x5   :  { %p152_p0 = scmp.ne.s32.totalorder %s16_s10, %s151_s11  ;;  %p157_p2 = scmp.lt.s32.totalorder %s151_s11, %s151_s11 }
   0x7   :  { %p158_p3 = por %p157_p2, %p156_p1 }
   0x9   :  { %p159_p4 = pnand %p158_p3, %p152_p0 }
   0xb   :  { %162 = shalt.err (!%p159_p4)
}
   0xc   :  { %s210_s12 = smov 64   ;;  %s211_s13 = smov 4  }
   0xd   :  { %21 = dma.hbm_to_vmem [thread:$0]  %s242_s0, 128, %s16_s10, [#allocation3], %s210_s12, %s210_s12, %s211_s13  }
   0xe   :  { %s212_s16 = smov [#allocation5]  }
   0xf   :  { %s27_s17 = sshll.u32 %s212_s16, 4  ;;  %s28_s17 = int_to_ptr.vmem [resolvable:$true] %s27_s17 }
  0x10   :  { %s171_s18 = scalar_lea.vmem %s28_s17, 128  ;;  %p176_p6 = scmp.lt.s32.totalorder %s28_s17, %s28_s17 }
  0x11   :  { %p172_p5 = scmp.ne.s32.totalorder %s28_s17, %s171_s18  ;;  %p177_p7 = scmp.lt.s32.totalorder %s171_s18, %s171_s18 }
  0x13   :  { %p178_p8 = por %p177_p7, %p176_p6 }
  0x15   :  { %p179_p9 = pnand %p178_p8, %p172_p5 }
  0x17   :  { %182 = shalt.err (!%p179_p9)
}
  0x18   :  { %33 = dma.hbm_to_vmem [thread:$0]  %s243_s1, 128, %s28_s17, [#allocation6], %s210_s12, %s210_s12, %s211_s13  }
  0x19   :  { %203 = dma.done.wait [#allocation3], 128  }
  0x1a   :  { %204 = vsyncadd [#allocation3], 4294967168 }
  0x1b   :  { %205 = dma.done.wait [#allocation6], 128  }
  0x1c   :  { %206 = vsyncadd [#allocation6], 4294967168  ;;  %v213_v0 = vmov 0.0   ;;  %vm214_vm0 = vmmov 0   ;;  %v141_v1 = vld [vmem:[#allocation5] sm:$0xff]   ;;  %v142_v2 = vld [vmem:[#allocation2] sm:$0xff]  }
  0x1d   :  { %126 = vmatprep.subr.bf16.mxu0 %v213_v0  ;;  %128 = vmatprep.mubr.msk.bf16.mxu0 %vm214_vm0, %v213_v0  ;;  %vm56_vm1 = vcmask 130048   ;;  %s215_s0 = smov [#allocation7]  }
  0x1e   :  { %127 = vmatpush3.bf16.msra.mxu0 %v141_v1  ;;  %s108_s21 = sshll.u32 %s215_s0, 4  ;;  %s109_s21 = int_to_ptr.vmem [resolvable:$true] %s108_s21 }
  0x1f   :  { %s183_s1 = scalar_lea.vmem %s109_s21, 256  ;;  %p188_p11 = scmp.lt.s32.totalorder %s109_s21, %s109_s21 }
  0x20   :  { %p184_p10 = scmp.ne.s32.totalorder %s109_s21, %s183_s1  ;;  %p189_p12 = scmp.lt.s32.totalorder %s183_s1, %s183_s1 }
  0x21   :  { %129 = vmatmul.mubr.msk.bf16.vlgmr.msra.gmra.mxu0 %vm56_vm1, %v142_v2 }
  0x22   :  { %p190_p13 = por %p189_p12, %p188_p11 }
  0x24   :  { %p191_p0 = pnand %p190_p13, %p184_p10 }
  0xe1   :  { %v94_v3 = vpop.f32.mrf.mxu0 }
  0xe2   :  { %101 = vst [vmem:[#allocation7] sm:$0xff] %v94_v3 }
  0xe3   :  { %v130_v4 = vpop.f32.mrf.mxu0 }
  0xe5   :  { %v97_v5 = vpop.f32.mrf.mxu0 }
  0xe6   :  { %102 = vst [vmem:[#allocation7 + $0x8] sm:$0xff] %v97_v5 }
  0xe7   :  { %v131_v6 = vpop.f32.mrf.mxu0 }
  0xe8   :  { %194 = shalt.err (!%p191_p0)
}
  0xe9   :  { %s216_s22 = smov 128   ;;  %s217_s23 = smov 8  }
  0xea   :  { %114 = dma.vmem_to_hbm [thread:$0]  %s109_s21, 256, %s244_s2, [#allocation4], %s216_s22, %s216_s22, %s217_s23  }
  0xeb   :  { %207 = dma.done.wait [#allocation4], 256  }
  0xec   :  { %208 = vsyncadd [#allocation4], 4294967040 }
  0xed   :  { %118 = vsyncpa [#allocation3], 1 }
  0xee   :  { %119 = vsyncpa [#allocation6], 1 }
  0xef   :  { %120 = vsyncpa [#allocation4], 1 }

</bundles_post_ra>
